<compile_context>
chip_gen: v5e
topology: v5e:2x2
jax: 0.10.0
libtpu: 0.0.40
codegen_flags: <defaults>
</compile_context>

<pallas_src>
import functools

import jax
import jax.numpy as jnp
from jax.experimental import pallas as pl
from jax.experimental.pallas import tpu as pltpu


def _round_up(n: int, m: int) -> int:
    return ((n + m - 1) // m) * m


def _cdiv(a: int, b: int) -> int:
    return -(-a // b)


@functools.lru_cache(maxsize=1)
def _use_bf16_tanh() -> bool:
    """bf16 EUP exists on v6e/v7x; v5e's EUP is f32-only."""
    try:
        kind = jax.devices()[0].device_kind.lower()
    except Exception:  # pragma: no cover - defensive
        return False
    return "v5" not in kind


def _head_kernel(x_ref, w1_ref, b1_ref, w2_ref, b2_ref, o_ref, *, bf16_tanh: bool):
    # Dropout is identity at inference time; implemented as a no-op.
    # Cast activations to bf16 on the VPU inside the kernel (not in the wrapper).
    x = x_ref[...].astype(jnp.bfloat16)                                 # [TB, H]
    # dense: bf16 MXU matmul with f32 accumulation; bias add in f32.
    h = jnp.dot(x, w1_ref[...], preferred_element_type=jnp.float32)    # f32 [TB, H]
    h = h + b1_ref[...]
    if bf16_tanh:
        h = jnp.tanh(h.astype(jnp.bfloat16))        # bf16 EUP (v6e/v7x)
    else:
        h = jnp.tanh(h).astype(jnp.bfloat16)        # f32 EUP (v5e)
    # out_proj: bf16 MXU matmul, f32 accumulation, f32 bias add.
    out = jnp.dot(h, w2_ref[...], preferred_element_type=jnp.float32)  # f32 [TB, Lp]
    o_ref[...] = (out + b2_ref[...]).astype(o_ref.dtype)


def prepare_head_params(w_dense, b_dense, w_out, b_out):
    """One-time parameter conversion (do NOT call per forward pass).

    w_dense: [H, H], b_dense: [H] or [1, H], w_out: [H, L], b_out: [L] or [1, L].
    Returns a dict of bf16 weights / f32 biases with the label axis padded to a
    lane-dense multiple of 128.
    """
    H = w_dense.shape[0]
    L = w_out.shape[1]
    assert w_dense.shape == (H, H), f"w_dense must be [H, H], got {w_dense.shape}"
    assert w_out.shape == (H, L), f"w_out must be [H, L], got {w_out.shape}"
    assert b_dense.size == H, f"b_dense must have {H} elements, got {b_dense.shape}"
    assert b_out.size == L, f"b_out must have {L} elements, got {b_out.shape}"

    w1 = jnp.asarray(w_dense, jnp.bfloat16)
    w2 = jnp.asarray(w_out, jnp.bfloat16)
    b1 = jnp.asarray(b_dense, jnp.float32).reshape(1, H)
    b2 = jnp.asarray(b_out, jnp.float32).reshape(1, L)

    Lp = _round_up(L, 128)
    if Lp != L:
        w2 = jnp.pad(w2, ((0, 0), (0, Lp - L)))
        b2 = jnp.pad(b2, ((0, 0), (0, Lp - L)))

    return {"w1": w1, "b1": b1, "w2": w2, "b2": b2, "num_labels": L}


def wav2vec2_classification_head(x, params):
    """x: [B, H] (f32 or bf16); params from prepare_head_params().

    Returns f32 logits of shape [B, num_labels].
    """
    w1, b1, w2, b2 = params["w1"], params["b1"], params["w2"], params["b2"]
    L = params["num_labels"]
    B, H = x.shape
    assert w1.shape == (H, H), f"hidden-size mismatch: x has H={H}, w1 {w1.shape}"
    Lp = w2.shape[1]

    # Sublane alignment for the batch axis depends on the x dtype
    # (f32 -> 8 rows/vreg, bf16 -> 16, int8/fp8 -> 32).
    itemsize = jnp.dtype(x.dtype).itemsize
    row_align = {4: 8, 2: 16, 1: 32}.get(itemsize, 8)

    # Adaptive batch tiling: minimal padding, <=512 rows per tile, and >=2 grid
    # programs when the batch is big enough (lets the "parallel" axis shard
    # across both v7x TensorCores; harmless elsewhere).
    MAX_TB = 512
    nsteps = max(1, _cdiv(B, MAX_TB))
    if nsteps == 1 and B >= 2 * row_align:
        nsteps = 2
    TB = _round_up(_cdiv(B, nsteps), row_align)
    Bp = nsteps * TB
    if Bp != B:
        x = jnp.pad(x, ((0, Bp - B), (0, 0)))

    # VMEM budget: single-buffered weights/biases + double-buffered x/out tiles.
    est_vmem = (
        w1.size * jnp.dtype(w1.dtype).itemsize
        + w2.size * jnp.dtype(w2.dtype).itemsize
        + b1.size * 4
        + b2.size * 4
        + 2 * TB * H * itemsize
        + 2 * TB * Lp * 4
    )
    vmem_limit = min(64 * 1024 * 1024, max(32 * 1024 * 1024, (est_vmem * 3) // 2))

    kernel = functools.partial(_head_kernel, bf16_tanh=_use_bf16_tanh())
    resident = pl.Buffered(1)  # constant-index inputs: no double buffer needed

    out = pl.pallas_call(
        kernel,
        out_shape=jax.ShapeDtypeStruct((Bp, Lp), jnp.float32),
        grid=(nsteps,),
        in_specs=[
            pl.BlockSpec((TB, H), lambda i: (i, 0)),                           # x tile, pipelined
            pl.BlockSpec((H, H), lambda i: (0, 0), pipeline_mode=resident),    # W_dense, VMEM-resident
            pl.BlockSpec((1, H), lambda i: (0, 0), pipeline_mode=resident),    # b_dense
            pl.BlockSpec((H, Lp), lambda i: (0, 0), pipeline_mode=resident),   # W_out (lane-padded)
            pl.BlockSpec((1, Lp), lambda i: (0, 0), pipeline_mode=resident),   # b_out (lane-padded)
        ],
        out_specs=pl.BlockSpec((TB, Lp), lambda i: (i, 0)),
        compiler_params=pltpu.CompilerParams(
            dimension_semantics=("parallel",),
            vmem_limit_bytes=int(vmem_limit),
        ),
    )(x, w1, b1, w2, b2)

    return out[:B, :L]


if __name__ == "__main__":
    # Small synthetic config: batch=2, hidden_size=32, num_labels=8.
    B, H, L = 2, 32, 8

    key = jax.random.PRNGKey(0)
    k_x, k_w1, k_b1, k_w2, k_b2 = jax.random.split(key, 5)

    # Deterministic parameter init (PyTorch Linear-style uniform +-1/sqrt(fan_in)).
    bound1 = 1.0 / jnp.sqrt(H)
    w_dense = jax.random.uniform(k_w1, (H, H), jnp.float32, -bound1, bound1)
    b_dense = jax.random.uniform(k_b1, (H,), jnp.float32, -bound1, bound1)   # 1-D like PyTorch
    w_out = jax.random.uniform(k_w2, (H, L), jnp.float32, -bound1, bound1)
    b_out = jax.random.uniform(k_b2, (L,), jnp.float32, -bound1, bound1)

    x = jax.random.normal(k_x, (B, H), jnp.float32)

    # One-time parameter prep (bf16 cast + label padding happen here, not per call).
    params = prepare_head_params(w_dense, b_dense, w_out, b_out)

    out = wav2vec2_classification_head(x, params)
    out = jax.block_until_ready(out)

    # Reference check in plain f32 JAX (bf16 MXU operands => relaxed tolerance).
    ref = jnp.tanh(x @ w_dense + b_dense[None, :]) @ w_out + b_out[None, :]
    assert out.shape == (B, L)
    assert jnp.allclose(out, ref, atol=2e-2, rtol=2e-2), (
        f"max abs err {jnp.max(jnp.abs(out - ref))}"
    )

    print("KERNEL_OK")
</pallas_src>

<mosaic_0001>
module attributes {stable_mosaic.version = 11 : i64} {
  func.func @_head_kernel(%arg0: i32, %arg1: memref<8x32xf32, #tpu.memory_space<vmem>>, %arg2: memref<32x32xbf16, #tpu.memory_space<vmem>>, %arg3: memref<1x32xf32, #tpu.memory_space<vmem>>, %arg4: memref<32x128xbf16, #tpu.memory_space<vmem>>, %arg5: memref<1x128xf32, #tpu.memory_space<vmem>>, %arg6: memref<8x128xf32, #tpu.memory_space<vmem>>) attributes {dimension_semantics = [#tpu.dimension_semantics<parallel>], iteration_bounds = array<i64: 1>, scalar_prefetch = 0 : i64, scratch_operands = 0 : i64, tpu.core_type = #tpu.core_type<tc>, window_params = [{transform_indices = @transform_0, window_bounds = array<i64: 8, 32>}, {pipeline_mode = #tpu.pipeline_mode<synchronous>, transform_indices = @transform_1, window_bounds = array<i64: 32, 32>}, {pipeline_mode = #tpu.pipeline_mode<synchronous>, transform_indices = @transform_2, window_bounds = array<i64: 1, 32>}, {pipeline_mode = #tpu.pipeline_mode<synchronous>, transform_indices = @transform_3, window_bounds = array<i64: 32, 128>}, {pipeline_mode = #tpu.pipeline_mode<synchronous>, transform_indices = @transform_4, window_bounds = array<i64: 1, 128>}, {transform_indices = @transform_5, window_bounds = array<i64: 8, 128>}]} {
    %c0 = arith.constant 0 : index
    %c0_0 = arith.constant 0 : index
    %0 = vector.load %arg1[%c0, %c0_0] : memref<8x32xf32, #tpu.memory_space<vmem>>, vector<8x32xf32>
    %1 = arith.truncf %0 : vector<8x32xf32> to vector<8x32xbf16>
    %c0_1 = arith.constant 0 : index
    %c0_2 = arith.constant 0 : index
    %2 = vector.load %arg2[%c0_1, %c0_2] : memref<32x32xbf16, #tpu.memory_space<vmem>>, vector<32x32xbf16>
    %cst = arith.constant dense<0.000000e+00> : vector<8x32xf32>
    %3 = tpu.matmul %1, %2, %cst {dimension_numbers = #tpu.dot_dimension_numbers<[1], [0], [0], [1], [0, 0, 1, 1], [], []>} : vector<8x32xbf16>, vector<32x32xbf16>, vector<8x32xf32> -> vector<8x32xf32>
    %c0_3 = arith.constant 0 : index
    %c0_4 = arith.constant 0 : index
    %4 = vector.load %arg3[%c0_3, %c0_4] : memref<1x32xf32, #tpu.memory_space<vmem>>, vector<1x32xf32>
    %5 = vector.broadcast %4 : vector<1x32xf32> to vector<8x32xf32>
    %6 = arith.addf %3, %5 : vector<8x32xf32>
    %7 = arith.truncf %6 : vector<8x32xf32> to vector<8x32xbf16>
    %8 = math.tanh %7 : vector<8x32xbf16>
    %c0_5 = arith.constant 0 : index
    %c0_6 = arith.constant 0 : index
    %9 = vector.load %arg4[%c0_5, %c0_6] : memref<32x128xbf16, #tpu.memory_space<vmem>>, vector<32x128xbf16>
    %cst_7 = arith.constant dense<0.000000e+00> : vector<8x128xf32>
    %10 = tpu.matmul %8, %9, %cst_7 {dimension_numbers = #tpu.dot_dimension_numbers<[1], [0], [0], [1], [0, 0, 1, 1], [], []>} : vector<8x32xbf16>, vector<32x128xbf16>, vector<8x128xf32> -> vector<8x128xf32>
    %c0_8 = arith.constant 0 : index
    %c0_9 = arith.constant 0 : index
    %11 = vector.load %arg5[%c0_8, %c0_9] : memref<1x128xf32, #tpu.memory_space<vmem>>, vector<1x128xf32>
    %12 = vector.broadcast %11 : vector<1x128xf32> to vector<8x128xf32>
    %13 = arith.addf %10, %12 : vector<8x128xf32>
    %c0_10 = arith.constant 0 : index
    %c0_11 = arith.constant 0 : index
    %14 = vector.load %arg6[%c0_10, %c0_11] : memref<8x128xf32, #tpu.memory_space<vmem>>, vector<8x128xf32>
    tpu.vector_store %arg6[%c0_10, %c0_11], %13 {strides = array<i32>} : memref<8x128xf32, #tpu.memory_space<vmem>>, vector<8x128xf32>,
    return
  }
  func.func @transform_0(%arg0: i32) -> (i32, i32) {
    %c0_i32 = arith.constant 0 : i32
    %c0_i32_0 = arith.constant 0 : i32
    return %arg0, %c0_i32 : i32, i32
  }
  func.func @transform_1(%arg0: i32) -> (i32, i32) {
    %c0_i32 = arith.constant 0 : i32
    %c0_i32_0 = arith.constant 0 : i32
    %c0_i32_1 = arith.constant 0 : i32
    return %c0_i32, %c0_i32_0 : i32, i32
  }
  func.func @transform_2(%arg0: i32) -> (i32, i32) {
    %c0_i32 = arith.constant 0 : i32
    %c0_i32_0 = arith.constant 0 : i32
    %c0_i32_1 = arith.constant 0 : i32
    return %c0_i32, %c0_i32_0 : i32, i32
  }
  func.func @transform_3(%arg0: i32) -> (i32, i32) {
    %c0_i32 = arith.constant 0 : i32
    %c0_i32_0 = arith.constant 0 : i32
    %c0_i32_1 = arith.constant 0 : i32
    return %c0_i32, %c0_i32_0 : i32, i32
  }
  func.func @transform_4(%arg0: i32) -> (i32, i32) {
    %c0_i32 = arith.constant 0 : i32
    %c0_i32_0 = arith.constant 0 : i32
    %c0_i32_1 = arith.constant 0 : i32
    return %c0_i32, %c0_i32_0 : i32, i32
  }
  func.func @transform_5(%arg0: i32) -> (i32, i32) {
    %c0_i32 = arith.constant 0 : i32
    %c0_i32_0 = arith.constant 0 : i32
    return %arg0, %c0_i32 : i32, i32
  }
}

</mosaic_0001>

<bundles_post_ra>
// kernel: tpu_custom_call.1
= control target key start
LH: loop header
LB: loop body
LE: loop exit
PB: predicated region body
PF: predicated region fallthrough
CT: control target
= control target key end

     0   :  { %10 = vsyncpa [#allocation3], 0  ;;  %s353_s0 = inlined_call_operand.hbm [shape: f32[8,32], index: 0, kind: input, shape index: {}]   ;;  %s354_s1 = inlined_call_operand.hbm [shape: bf16[32,32], index: 1, kind: input, shape index: {}]   ;;  %s355_s2 = inlined_call_operand.vmem [shape: f32[1,32], index: 2, kind: input, shape index: {}]   ;;  %s356_s3 = inlined_call_operand.hbm [shape: bf16[32,128], index: 3, kind: input, shape index: {}]   ;;  %s357_s4 = inlined_call_operand.vmem [shape: f32[1,128], index: 4, kind: input, shape index: {}]   ;;  %s358_s5 = inlined_call_operand.hbm [shape: f32[8,128], index: 5, kind: output, shape index: {}]  }
   0x1   :  { %11 = vsyncpa [#allocation6], 0  ;;  %s28_s20 = sshll.u32 %s354_s1, 4  ;;  %s29_s20 = int_to_ptr.hbm [resolvable:$true] %s28_s20 }
   0x2   :  { %12 = vsyncpa [#allocation4], 0  ;;  %s299_s21 = smov [#allocation5]   ;;  %s18_s25 = sshll.u32 %s353_s0, 4  ;;  %s19_s25 = int_to_ptr.hbm [resolvable:$true] %s18_s25 }
   0x3   :  { %s30_s22 = sshll.u32 %s299_s21, 4  ;;  %s300_s26 = smov 64   ;;  %s31_s22 = int_to_ptr.vmem [resolvable:$true] %s30_s22 }
   0x4   :  { %s301_s27 = smov 4   ;;  %s302_s28 = smov [#allocation2]  }
   0x5   :  { %36 = dma.hbm_to_vmem [thread:$0]  %s29_s20, 256, %s31_s22, [#allocation6], %s300_s26, %s300_s26, %s301_s27  }
   0x6   :  { %s20_s29 = sshll.u32 %s302_s28, 4  ;;  %s43_s7 = sshll.u32 %s356_s3, 4  ;;  %s21_s29 = int_to_ptr.vmem [resolvable:$true] %s20_s29  ;;  %s44_s7 = int_to_ptr.hbm [resolvable:$true] %s43_s7 }
   0x7   :  { %23 = dma.hbm_to_vmem [thread:$0]  %s19_s25, 128, %s21_s29, [#allocation3]  }
   0x8   :  { %s303_s1 = smov [#allocation7]  }
   0x9   :  { %s45_s8 = sshll.u32 %s303_s1, 4  ;;  %s46_s8 = int_to_ptr.vmem [resolvable:$true] %s45_s8 }
   0xa   :  { %51 = dma.hbm_to_vmem [thread:$0]  %s44_s7, 256, %s46_s8, [#allocation6], %s300_s26, %s300_s26, %s301_s27  }
   0xb   :  { %293 = dma.done.wait [#allocation3], 128  }
   0xc   :  { %294 = vsyncadd [#allocation3], 4294967168 }
   0xd   :  { %295 = dma.done.wait [#allocation6], 512  }
   0xe   :  { %296 = vsyncadd [#allocation6], 4294966784  ;;  %v184_v0 = vld [vmem:[#allocation5 + $0x8] sm:$0xff]  ;;  %v183_v1 = vld [vmem:[#allocation5] sm:$0xff]  ;;  %vm89_vm0 = vcmask 261120   ;;  %s304_s11 = smov [#allocation8]  }
   0xf   :  { %99 = vmatpush.bf16.msra.mxu0 %v184_v0  ;;  %v67_v2 = vld [vmem:[#allocation2] sm:$0xff]  ;;  %v185_v5 = vld [vmem:[#allocation7] sm:$0xff]  ;;  %s152_s12 = sshll.u32 %s304_s11, 4  ;;  %s154_s15 = sshll.u32 %s358_s5, 4  ;;  %s153_s12 = int_to_ptr.vmem [resolvable:$true] %s152_s12  ;;  %s155_s15 = int_to_ptr.hbm [resolvable:$true] %s154_s15 }
  0x10   :  { %v68_v3 = vpack.c.bf16 %v67_v2, %v67_v2  ;;  %v186_v4 = vld [vmem:[#allocation7 + $0x8] sm:$0xff] }
  0x11   :  { %139 = vmatpush.bf16.msra.mxu1 %v186_v4  ;;  %v193_v6 = vld [vmem:[%s355_s2] ss:$0 sm:$0xff] }
  0x12   :  { %v194_v14 = vld [vmem:[%s357_s4] ss:$0 sm:$0xff] }
  0x13   :  { %100 = vmatpush.bf16.msra.mxu0 %v183_v1 }
  0x15   :  { %140 = vmatpush.bf16.msra.mxu1 %v185_v5 }
  0x16   :  { %173 = vmatmul.msk.bf16.vlgmr.msra.gmra.mxu0 %vm89_vm0, %v68_v3 }
  0x93   :  { %v102_v7 = vpop.f32.mrf.mxu0 }
  0x94   :  { %v103_v8 = vadd.f32 %v193_v6, %v102_v7 }
  0x96   :  { %v106_v9 = vpack.c.bf16 %v103_v8, %v103_v8 }
  0x98   :  { %v107_v10 = vunpack.c.l.bf16 %v106_v9 }
  0x9a   :  { %195 = vtanh.f32 %v107_v10 }
  0x9b   :  { %v104_v11 = vpop.f32.mrf.mxu0 }
  0xa0   :  { %v196_v12 = vpop.eup %195 }
  0xa1   :  { %v109_v13 = vpack.c.bf16 %v196_v12, %v196_v12 }
  0xa3   :  { %182 = vmatmul.msk.bf16.vlgmr.msra.gmra.mxu1 %vm89_vm0, %v109_v13 }
 0x120   :  { %v142_v15 = vpop.f32.mrf.mxu1 }
 0x121   :  { %v143_v16 = vadd.f32 %v194_v14, %v142_v15 }
 0x123   :  { %146 = vst [vmem:[#allocation8] sm:$0xff] %v143_v16 }
 0x124   :  { %157 = dma.vmem_to_hbm [thread:$0]  %s153_s12, 128, %s155_s15, [#allocation4]  }
 0x128   :  { %v144_v17 = vpop.f32.mrf.mxu1 }
 0x129   :  { %297 = dma.done.wait [#allocation4], 128  }
 0x12a   :  { %298 = vsyncadd [#allocation4], 4294967168 }
 0x12b   :  { %162 = vsyncpa [#allocation3], 1 }
 0x12c   :  { %163 = vsyncpa [#allocation6], 1 }
 0x12d   :  { %164 = vsyncpa [#allocation4], 1 }

</bundles_post_ra>
